<compile_context>
chip_gen: v5e
topology: v5e:2x2
jax: 0.10.0
libtpu: 0.0.40
codegen_flags: <defaults>
</compile_context>

<pallas_src>
import jax
import jax.numpy as jnp
from jax.experimental import pallas as pl
from jax.experimental.pallas import tpu as pltpu

# ---------------- config (SparseTSF hyperparameters) ----------------
SEQ_LEN = 16
PRED_LEN = 8
ENC_IN = 4
PERIOD_LEN = 4
D_MODEL = 32          # unused for model_type='linear'
MODEL_TYPE = "linear"
USE_REVIN = True
EPS = 1e-5

SEG_NUM_X = SEQ_LEN // PERIOD_LEN      # 4
SEG_NUM_Y = PRED_LEN // PERIOD_LEN     # 2
KSIZE = 1 + 2 * (PERIOD_LEN // 2)      # 5
PAD = PERIOD_LEN // 2                  # 2


# ---------------- Pallas kernel ----------------
def sparse_tsf_kernel(x_ref, fused_ref, aw_ref, ab_ref, o_ref):
    # x: [L, N]  (time on sublanes, batch*channel packed on lanes, N = B*C)
    x = x_ref[...]
    aw = aw_ref[...]          # [1, N] RevIN affine weight (tiled per batch)
    ab = ab_ref[...]          # [1, N] RevIN affine bias   (tiled per batch)

    # ---- RevIN 'norm': per-(batch,channel) stats over time = per-column ----
    mean = jnp.mean(x, axis=0, keepdims=True)                   # [1, N]
    xm = x - mean
    var = jnp.mean(xm * xm, axis=0, keepdims=True)              # [1, N]
    stdev = jnp.sqrt(var + EPS)                                 # [1, N]
    norm_scale = pl.reciprocal(stdev) * aw                      # [1, N] row, once
    xn = xm * norm_scale + ab                                   # [L, N]

    # ---- remove sequence mean (torch.mean(x, dim=1)) ----
    seq_mean = jnp.mean(xn, axis=0, keepdims=True)              # [1, N]
    xc = xn - seq_mean                                          # [L, N]

    # ---- fused (segment-linear o (I + conv1d)) single MXU matmul ----
    y = jnp.dot(fused_ref[...], xc,
                preferred_element_type=jnp.float32)             # [P_out, N]
    y = y + seq_mean

    # ---- RevIN 'denorm' folded into one scale/offset multiply-add ----
    scale = stdev * pl.reciprocal(aw + EPS * EPS)               # [1, N]
    offset = mean - ab * scale                                  # [1, N]
    o_ref[...] = y * scale + offset


def sparse_tsf_forward(x, fused, aw, ab):
    B, L, C = x.shape
    P_out = fused.shape[0]
    N = B * C

    # Pack batch*channel onto lanes (layout plumbing outside the kernel).
    x2 = jnp.transpose(x, (1, 0, 2)).reshape(L, N)              # [L, B*C]
    aw_t = jnp.tile(aw, (1, B))                                 # [1, B*C]
    ab_t = jnp.tile(ab, (1, B))                                 # [1, B*C]

    flops = 2 * P_out * L * N + 12 * L * N
    bytes_accessed = 4 * (L * N + P_out * L + 2 * N + P_out * N)

    y2 = pl.pallas_call(
        sparse_tsf_kernel,
        out_shape=jax.ShapeDtypeStruct((P_out, N), jnp.float32),
        cost_estimate=pl.CostEstimate(
            flops=flops,
            transcendentals=2 * N,          # sqrt + reciprocals on [1,N] rows
            bytes_accessed=bytes_accessed),
    )(x2, fused, aw_t, ab_t)
    # TODO(synk): for very large B*C, tile the lane dimension with a
    # ("parallel",) grid of 128-multiple blocks instead of one whole-array call.

    return jnp.transpose(y2.reshape(P_out, B, C), (1, 0, 2))    # [B, P_out, C]


# ---------------- parameter setup (plain JAX glue) ----------------
def build_conv_matrix(w_conv, seq_len, ksize, pad):
    # conv_out[t] = sum_j w[j] * x[t + j - pad]  (zero padded)
    t = jnp.arange(seq_len)[:, None]
    s = jnp.arange(seq_len)[None, :]
    d = s - t + pad
    valid = (d >= 0) & (d < ksize)
    return jnp.where(valid, w_conv[jnp.clip(d, 0, ksize - 1)], 0.0).astype(jnp.float32)


def build_segment_linear_matrix(w_lin, pred_len, seq_len, period):
    # y_time[sy*period + p] = sum_sx w_lin[sy, sx] * x_time[sx*period + p]
    to = jnp.arange(pred_len)[:, None]
    ti = jnp.arange(seq_len)[None, :]
    same_phase = (to % period) == (ti % period)
    return jnp.where(same_phase,
                     w_lin[to // period, ti // period], 0.0).astype(jnp.float32)


def build_fused_matrix(cmat, mmat):
    # y = mmat @ (cmat @ xc + xc) = (mmat @ (I + cmat)) @ xc
    L = cmat.shape[0]
    return (mmat @ (jnp.eye(L, dtype=jnp.float32) + cmat)).astype(jnp.float32)


# ---------------- pure-JAX reference (for correctness check) ----------------
def ref_forward(x, cmat, mmat, aw, ab):
    mean = jnp.mean(x, axis=1, keepdims=True)
    var = jnp.mean((x - mean) ** 2, axis=1, keepdims=True)
    stdev = jnp.sqrt(var + EPS)
    xn = (x - mean) / stdev * aw + ab
    seq_mean = jnp.mean(xn, axis=1, keepdims=True)
    xc = xn - seq_mean
    xr = jnp.einsum('ts,bsc->btc', cmat, xc) + xc
    y = jnp.einsum('ts,bsc->btc', mmat, xr) + seq_mean
    y = (y - ab) / (aw + EPS * EPS) * stdev + mean
    return y


if __name__ == "__main__":
    key = jax.random.PRNGKey(0)
    k_x, k_conv, k_lin = jax.random.split(key, 3)

    B = 2
    x = jax.random.normal(k_x, (B, SEQ_LEN, ENC_IN), dtype=jnp.float32)

    # Deterministic synthetic weights (shapes per the module __init__).
    w_conv = 0.1 * jax.random.normal(k_conv, (KSIZE,), dtype=jnp.float32)        # Conv1d(1,1,K) no bias
    w_lin = 0.1 * jax.random.normal(k_lin, (SEG_NUM_Y, SEG_NUM_X), jnp.float32)  # Linear(seg_x, seg_y) no bias
    aff_w = jnp.ones((1, ENC_IN), dtype=jnp.float32)    # RevIN affine_weight init = ones
    aff_b = jnp.zeros((1, ENC_IN), dtype=jnp.float32)   # RevIN affine_bias init = zeros
    # TODO(synk): model_type='mlp' branch (two Linears + ReLU) not exercised here; 'linear' path implemented.

    cmat = build_conv_matrix(w_conv, SEQ_LEN, KSIZE, PAD)                      # [L, L]
    mmat = build_segment_linear_matrix(w_lin, PRED_LEN, SEQ_LEN, PERIOD_LEN)   # [pred_len, L]
    fused = build_fused_matrix(cmat, mmat)                                     # [pred_len, L]

    y = sparse_tsf_forward(x, fused, aff_w, aff_b)
    y = jax.block_until_ready(y)

    y_ref = ref_forward(x, cmat, mmat, aff_w, aff_b)
    assert y.shape == (B, PRED_LEN, ENC_IN)
    assert jnp.allclose(y, y_ref, atol=1e-4, rtol=1e-4)

    print("KERNEL_OK")
</pallas_src>

<mosaic_0001>
module attributes {stable_mosaic.version = 11 : i64} {
  func.func @sparse_tsf_kernel(%arg0: memref<16x8xf32, #tpu.memory_space<vmem>>, %arg1: memref<8x16xf32, #tpu.memory_space<vmem>>, %arg2: memref<1x8xf32, #tpu.memory_space<vmem>>, %arg3: memref<1x8xf32, #tpu.memory_space<vmem>>, %arg4: memref<8x8xf32, #tpu.memory_space<vmem>>) attributes {dimension_semantics = [], scalar_prefetch = 0 : i64, scratch_operands = 0 : i64, tpu.core_type = #tpu.core_type<tc>} {
    %c0 = arith.constant 0 : index
    %c0_0 = arith.constant 0 : index
    %0 = vector.load %arg0[%c0, %c0_0] : memref<16x8xf32, #tpu.memory_space<vmem>>, vector<16x8xf32>
    %c0_1 = arith.constant 0 : index
    %c0_2 = arith.constant 0 : index
    %1 = vector.load %arg2[%c0_1, %c0_2] : memref<1x8xf32, #tpu.memory_space<vmem>>, vector<1x8xf32>
    %c0_3 = arith.constant 0 : index
    %c0_4 = arith.constant 0 : index
    %2 = vector.load %arg3[%c0_3, %c0_4] : memref<1x8xf32, #tpu.memory_space<vmem>>, vector<1x8xf32>
    %cst = arith.constant dense<0.000000e+00> : vector<8xf32>
    %3 = vector.multi_reduction <add>, %0, %cst [0] : vector<16x8xf32> to vector<8xf32>
    %4 = vector.shape_cast %3 : vector<8xf32> to vector<1x8xf32>
    %cst_5 = arith.constant 1.600000e+01 : f32
    %5 = vector.broadcast %cst_5 : f32 to vector<1x8xf32>
    %6 = arith.divf %4, %5 : vector<1x8xf32>
    %7 = vector.broadcast %6 : vector<1x8xf32> to vector<16x8xf32>
    %8 = arith.subf %0, %7 : vector<16x8xf32>
    %9 = arith.mulf %8, %8 : vector<16x8xf32>
    %cst_6 = arith.constant dense<0.000000e+00> : vector<8xf32>
    %10 = vector.multi_reduction <add>, %9, %cst_6 [0] : vector<16x8xf32> to vector<8xf32>
    %11 = vector.shape_cast %10 : vector<8xf32> to vector<1x8xf32>
    %cst_7 = arith.constant 1.600000e+01 : f32
    %12 = vector.broadcast %cst_7 : f32 to vector<1x8xf32>
    %13 = arith.divf %11, %12 : vector<1x8xf32>
    %cst_8 = arith.constant 9.99999974E-6 : f32
    %14 = vector.broadcast %cst_8 : f32 to vector<1x8xf32>
    %15 = arith.addf %13, %14 : vector<1x8xf32>
    %16 = math.sqrt %15 : vector<1x8xf32>
    %17 = tpu.reciprocal %16 : vector<1x8xf32> -> vector<1x8xf32>
    %18 = arith.mulf %17, %1 : vector<1x8xf32>
    %19 = vector.broadcast %18 : vector<1x8xf32> to vector<16x8xf32>
    %20 = arith.mulf %8, %19 : vector<16x8xf32>
    %21 = vector.broadcast %2 : vector<1x8xf32> to vector<16x8xf32>
    %22 = arith.addf %20, %21 : vector<16x8xf32>
    %cst_9 = arith.constant dense<0.000000e+00> : vector<8xf32>
    %23 = vector.multi_reduction <add>, %22, %cst_9 [0] : vector<16x8xf32> to vector<8xf32>
    %24 = vector.shape_cast %23 : vector<8xf32> to vector<1x8xf32>
    %cst_10 = arith.constant 1.600000e+01 : f32
    %25 = vector.broadcast %cst_10 : f32 to vector<1x8xf32>
    %26 = arith.divf %24, %25 : vector<1x8xf32>
    %27 = vector.broadcast %26 : vector<1x8xf32> to vector<16x8xf32>
    %28 = arith.subf %22, %27 : vector<16x8xf32>
    %c0_11 = arith.constant 0 : index
    %c0_12 = arith.constant 0 : index
    %29 = vector.load %arg1[%c0_11, %c0_12] : memref<8x16xf32, #tpu.memory_space<vmem>>, vector<8x16xf32>
    %cst_13 = arith.constant dense<0.000000e+00> : vector<8x8xf32>
    %30 = tpu.matmul %29, %28, %cst_13 {dimension_numbers = #tpu.dot_dimension_numbers<[1], [0], [0], [1], [0, 0, 1, 1], [], []>} : vector<8x16xf32>, vector<16x8xf32>, vector<8x8xf32> -> vector<8x8xf32>
    %31 = vector.broadcast %26 : vector<1x8xf32> to vector<8x8xf32>
    %32 = arith.addf %30, %31 : vector<8x8xf32>
    %cst_14 = arith.constant 1.000000e-10 : f32
    %33 = vector.broadcast %cst_14 : f32 to vector<1x8xf32>
    %34 = arith.addf %1, %33 : vector<1x8xf32>
    %35 = tpu.reciprocal %34 : vector<1x8xf32> -> vector<1x8xf32>
    %36 = arith.mulf %16, %35 : vector<1x8xf32>
    %37 = arith.mulf %2, %36 : vector<1x8xf32>
    %38 = arith.subf %6, %37 : vector<1x8xf32>
    %39 = vector.broadcast %36 : vector<1x8xf32> to vector<8x8xf32>
    %40 = arith.mulf %32, %39 : vector<8x8xf32>
    %41 = vector.broadcast %38 : vector<1x8xf32> to vector<8x8xf32>
    %42 = arith.addf %40, %41 : vector<8x8xf32>
    %c0_15 = arith.constant 0 : index
    %c0_16 = arith.constant 0 : index
    %43 = vector.load %arg4[%c0_15, %c0_16] : memref<8x8xf32, #tpu.memory_space<vmem>>, vector<8x8xf32>
    tpu.vector_store %arg4[%c0_15, %c0_16], %42 {strides = array<i32>} : memref<8x8xf32, #tpu.memory_space<vmem>>, vector<8x8xf32>,
    return
  }
}

</mosaic_0001>

<bundles_post_ra>
// kernel: tpu_custom_call.1
= control target key start
LH: loop header
LB: loop body
LE: loop exit
PB: predicated region body
PF: predicated region fallthrough
CT: control target
= control target key end

     0   :  { %vm22_vm0 = vcmask 64512   ;;  %v204_v4 = vmov 16.0   ;;  %s269_s0 = inlined_call_operand.vmem [shape: f32[16,8], index: 0, kind: input, shape index: {}]   ;;  %s270_s1 = inlined_call_operand.vmem [shape: f32[8,16], index: 1, kind: input, shape index: {}]   ;;  %s271_s2 = inlined_call_operand.vmem [shape: f32[1,8], index: 2, kind: input, shape index: {}]   ;;  %s272_s3 = inlined_call_operand.vmem [shape: f32[1,8], index: 3, kind: input, shape index: {}]   ;;  %s273_s4 = inlined_call_operand.hbm [shape: f32[8,8], index: 4, kind: output, shape index: {}]  }
   0x1   :  { %v18_v0 = vld [vmem:[%s269_s0] sm:$0xff]  ;;  %v19_v1 = vld [vmem:[%s269_s0 + $0x8] sm:$0xff]  ;;  %170 = vrcp.f32 %v204_v4 }
   0x2   :  { %v23_v2 = vsel %vm22_vm0, %v18_v0, 0.0  ;;  %v24_v3 = vsel %vm22_vm0, %v19_v1, 0.0 }
   0x3   :  { %9 = vsyncpa [#allocation3], 0  ;;  %v25_v5 = vadd.f32 %v24_v3, %v23_v2  ;;  %v20_v49 = vld [vmem:[%s271_s2] sm:$0x1]  ;;  %vm103_vm12 = vcmask 130048   ;;  %s205_s25 = smov [#allocation2]  }
   0x4   :  { %v127_v52 = vadd.f32 1e-10, %v20_v49  ;;  %v169_v58 = vld [vmem:[%s272_s3] ss:$0 sm:$0xff]  ;;  %s155_s26 = sshll.u32 %s205_s25, 4  ;;  %s156_s26 = int_to_ptr.vmem [resolvable:$true] %s155_s26 }
   0x5   :  { %v26_v6 = vrot.slane %v25_v5, 4 }
   0x6   :  { %vm133_vm8 = vweird.f32 %v127_v52  ;;  %v137_v63 = vand.u32 2147483647, %v127_v52 }
   0x7   :  { %v27_v7 = vadd.f32 %v26_v6, %v25_v5  ;;  %v171_v8 = vpop.eup %170 }
   0x8   :  { %v33_v10 = vmul.f32 16.0, %v171_v8  ;;  %vm37_vm1 = vweird.f32 %v171_v8  ;;  %vm138_vm11 = vcmp.eq.f32.partialorder %v137_v63, 8.507059e+37 }
   0x9   :  { %v28_v9 = vrot.slane %v27_v7, 2 }
   0xa   :  { %v34_v12 = vsub.f32 1.0, %v33_v10 }
   0xb   :  { %v29_v11 = vadd.f32 %v28_v9, %v27_v7 }
   0xc   :  { %v35_v14 = vmul.f32 %v171_v8, %v34_v12 }
   0xd   :  { %v30_v13 = vrot.slane %v29_v11, 1 }
   0xe   :  { %v36_v16 = vadd.f32 %v171_v8, %v35_v14 }
   0xf   :  { %v31_v15 = vadd.f32 %v30_v13, %v29_v11 }
  0x10   :  { %v239_v17 = vsel %vm37_vm1, %v171_v8, %v36_v16 }
  0x11   :  { %v242_v18 = vmul.f32 %v239_v17, %v31_v15 }
  0x13   :  { %v40_v19 = vsub.f32 %v18_v0, %v242_v18  ;;  %v41_v20 = vsub.f32 %v19_v1, %v242_v18  ;;  %v139_v0 = vand.u32 2147483648, %v127_v52 }
  0x15   :  { %v42_v21 = vmul.f32 %v40_v19, %v40_v19  ;;  %v43_v22 = vmul.f32 %v41_v20, %v41_v20  ;;  %v140_v8 = vor.u32 1.1754944e-38, %v139_v0 }
  0x17   :  { %v44_v23 = vsel %vm22_vm0, %v42_v21, 0.0  ;;  %v45_v24 = vsel %vm22_vm0, %v43_v22, 0.0 }
  0x18   :  { %v46_v25 = vadd.f32 %v45_v24, %v44_v23  ;;  %v102_v24 = vld [vmem:[%s270_s1] sm:$0xff]  ;;  %s157_s1 = sshll.u32 %s273_s4, 4  ;;  %s158_s1 = int_to_ptr.hbm [resolvable:$true] %s157_s1 }
  0x1a   :  { %v47_v26 = vrot.slane %v46_v25, 4 }
  0x1c   :  { %v48_v27 = vadd.f32 %v47_v26, %v46_v25  ;;  %v21_v25 = vld [vmem:[%s272_s3] sm:$0x1] }
  0x1e   :  { %v49_v28 = vrot.slane %v48_v27, 2 }
  0x20   :  { %v50_v29 = vadd.f32 %v49_v28, %v48_v27 }
  0x22   :  { %v51_v30 = vrot.slane %v50_v29, 1 }
  0x24   :  { %v52_v31 = vadd.f32 %v51_v30, %v50_v29 }
  0x26   :  { %v53_v32 = vmul.f32 %v52_v31, %v239_v17 }
  0x28   :  { %v54_v33 = vadd.f32 1e-05, %v53_v32 }
  0x2a   :  { %172 = vrsqrt.f32 %v54_v33  ;;  %vm62_vm2 = vcmp.eq.f32.partialorder %v54_v33, inf  ;;  %v65_v40 = vand.u32 2147483648, %v54_v33  ;;  %vm64_vm3 = vcmp.eq.f32.partialorder %v54_v33, 0.0 }
  0x30   :  { %v173_v34 = vpop.eup %172 }
  0x31   :  { %v56_v35 = vmul.f32 %v173_v34, %v54_v33 }
  0x33   :  { %v57_v36 = vmul.f32 %v173_v34, %v56_v35 }
  0x35   :  { %v58_v37 = vmul.f32 0.5, %v57_v36 }
  0x37   :  { %v59_v38 = vsub.f32 1.5, %v58_v37 }
  0x39   :  { %v60_v39 = vmul.f32 %v173_v34, %v59_v38 }
  0x3b   :  { %v61_v41 = vmul.f32 %v60_v39, %v54_v33 }
  0x3d   :  { %v63_v42 = vsel %vm62_vm2, %v54_v33, %v61_v41 }
  0x3e   :  { %v66_v43 = vsel %vm64_vm3, %v65_v40, %v63_v42 }
  0x3f   :  { %174 = vrcp.f32 %v66_v43  ;;  %v78_v46 = vand.u32 2147483648, %v66_v43  ;;  %vm72_vm4 = vweird.f32 %v66_v43  ;;  %v76_v48 = vand.u32 2147483647, %v66_v43 }
  0x40   :  { %176 = vrcp.f32 %v127_v52 }
  0x41   :  { %v79_v51 = vor.u32 1.1754944e-38, %v78_v46  ;;  %vm77_vm7 = vcmp.eq.f32.partialorder %v76_v48, 8.507059e+37 }
  0x45   :  { %v175_v44 = vpop.eup %174 }
  0x46   :  { %v68_v45 = vmul.f32 %v175_v44, %v66_v43  ;;  %vm73_vm5 = vweird.f32 %v175_v44  ;;  %v177_v59 = vpop.eup %176 }
  0x47   :  { %vm74_vm6 = vmor %vm72_vm4, %vm73_vm5  ;;  %v129_v62 = vmul.f32 %v177_v59, %v127_v52  ;;  %vm134_vm9 = vweird.f32 %v177_v59 }
  0x48   :  { %v69_v47 = vsub.f32 1.0, %v68_v45  ;;  %vm135_vm10 = vmor %vm133_vm8, %vm134_vm9 }
  0x49   :  { %v130_v3 = vsub.f32 1.0, %v129_v62 }
  0x4a   :  { %v70_v50 = vmul.f32 %v175_v44, %v69_v47 }
  0x4b   :  { %v131_v6 = vmul.f32 %v177_v59, %v130_v3 }
  0x4c   :  { %v71_v53 = vadd.f32 %v175_v44, %v70_v50 }
  0x4d   :  { %v132_v9 = vadd.f32 %v177_v59, %v131_v6 }
  0x4e   :  { %v75_v54 = vsel %vm74_vm6, %v175_v44, %v71_v53 }
  0x4f   :  { %v80_v55 = vsel %vm77_vm7, %v79_v51, %v75_v54  ;;  %v136_v11 = vsel %vm135_vm10, %v177_v59, %v132_v9 }
  0x50   :  { %v81_v56 = vmul.f32 %v80_v55, %v20_v49  ;;  %v141_v13 = vsel %vm138_vm11, %v140_v8, %v136_v11 }
  0x51   :  { %v142_v14 = vmul.f32 %v141_v13, %v66_v43 }
  0x52   :  { %v82_v57 = vperm.slane %v81_v56, 0 }
  0x53   :  { %v143_v26 = vmul.f32 %v142_v14, %v21_v25  ;;  %v145_v28 = vperm.slane %v142_v14, 0 }
  0x54   :  { %v83_v60 = vmul.f32 %v82_v57, %v40_v19  ;;  %v84_v61 = vmul.f32 %v82_v57, %v41_v20 }
  0x55   :  { %v144_v27 = vsub.f32 %v242_v18, %v143_v26 }
  0x56   :  { %v88_v1 = vadd.f32 %v169_v58, %v83_v60  ;;  %v89_v2 = vadd.f32 %v169_v58, %v84_v61 }
  0x57   :  { %v147_v30 = vperm.slane %v144_v27, 0 }
  0x58   :  { %v90_v4 = vsel %vm22_vm0, %v88_v1, 0.0  ;;  %v91_v5 = vsel %vm22_vm0, %v89_v2, 0.0 }
  0x59   :  { %v92_v7 = vadd.f32 %v91_v5, %v90_v4 }
  0x5b   :  { %v93_v10 = vrot.slane %v92_v7, 4 }
  0x5d   :  { %v94_v12 = vadd.f32 %v93_v10, %v92_v7 }
  0x5f   :  { %v95_v15 = vrot.slane %v94_v12, 2 }
  0x61   :  { %v96_v16 = vadd.f32 %v95_v15, %v94_v12 }
  0x63   :  { %v97_v19 = vrot.slane %v96_v16, 1 }
  0x65   :  { %v98_v20 = vadd.f32 %v97_v19, %v96_v16 }
  0x67   :  { %v99_v21 = vmul.f32 %v98_v20, %v239_v17 }
  0x69   :  { %v101_v22 = vsub.f32 %v89_v2, %v99_v21  ;;  %v100_v23 = vsub.f32 %v88_v1, %v99_v21 }
  0x6b   :  { %121 = vmatpush.msra.mxu0 %v101_v22 }
  0x6d   :  { %122 = vmatpush.msra.mxu0 %v100_v23 }
  0x6e   :  { %166 = vmatmul.msk.f32.vlgmr.msra.gmra.mxu0 %vm103_vm12, %v102_v24 }
  0xeb   :  { %v124_v29 = vpop.f32.mrf.mxu0 }
  0xec   :  { %v125_v17 = vadd.f32 %v124_v29, %v99_v21 }
  0xee   :  { %v146_v31 = vmul.f32 %v145_v28, %v125_v17 }
  0xf0   :  { %v148_v32 = vadd.f32 %v147_v30, %v146_v31 }
  0xf2   :  { %149 = vst.msk [vmem:[#allocation2] sm:$0xff] %vm22_vm0, %v148_v32 }
  0xf3   :  { %160 = dma.vmem_to_hbm [thread:$0]  %s156_s26, 128, %s158_s1, [#allocation3]  }
  0xf4   :  { %202 = dma.done.wait [#allocation3], 128  }
  0xf5   :  { %203 = vsyncadd [#allocation3], 4294967168 }
  0xf6   :  { %165 = vsyncpa [#allocation3], 1 }

</bundles_post_ra>
